<compile_context>
chip_gen: v6e
topology: v6e:2x2x1
jax: 0.10.0
libtpu: 0.0.40
codegen_flags: <defaults>
</compile_context>

<pallas_src>
import jax
import jax.numpy as jnp
from jax.experimental import pallas as pl
from jax.experimental.pallas import tpu as pltpu


def _swigelu_kernel(x_ref, o_ref):
    x = x_ref[...]
    xf = x.astype(jnp.float32)
    y = xf * jax.nn.sigmoid(1.702 * xf)
    o_ref[...] = y.astype(o_ref.dtype)


def _choose_lane(n, max_lane=2048):
    """Largest multiple of 128 (<= max_lane) that divides n, else None."""
    lane = max_lane
    while lane >= 128:
        if n % lane == 0:
            return lane
        lane -= 128
    return None


def swigelu(x, *, target_block_bytes=2 * 1024 * 1024, max_lane=2048):
    orig_shape = x.shape
    dtype = x.dtype
    n = int(x.size)
    if n == 0:
        return x

    flat = x.reshape(-1)

    # Lane-dense layout: pick a lane width that divides n exactly (no padding,
    # no extra HBM passes). Only fall back to padding a tiny flat tail when no
    # multiple-of-128 divisor exists.
    lane = _choose_lane(n, max_lane)
    if lane is None:
        lane = min(1024, ((n + 127) // 128) * 128)
        rows = -(-n // lane)
        pad_n = rows * lane - n
        flat = jnp.pad(flat, (0, pad_n))
    else:
        rows = n // lane
        pad_n = 0

    x2 = flat.reshape(rows, lane)

    # Block rows: ~2 MiB per block, rounded to a multiple of 32 so the
    # second-to-last block dim satisfies the sublane rule for f32/bf16/int8.
    itemsize = jnp.dtype(dtype).itemsize
    br = target_block_bytes // (lane * itemsize)
    br = max(32, (br // 32) * 32)
    if rows <= br:
        br = rows  # full-extent block (always legal)

    grid = (pl.cdiv(rows, br),)

    out = pl.pallas_call(
        _swigelu_kernel,
        out_shape=jax.ShapeDtypeStruct((rows, lane), dtype),
        grid_spec=pltpu.PrefetchScalarGridSpec(
            num_scalar_prefetch=0,
            grid=grid,
            in_specs=[pl.BlockSpec((br, lane), lambda i: (i, 0))],
            out_specs=pl.BlockSpec((br, lane), lambda i: (i, 0)),
        ),
        compiler_params=pltpu.CompilerParams(
            dimension_semantics=("parallel",),
        ),
    )(x2)

    out_flat = out.reshape(-1)
    if pad_n:
        out_flat = out_flat[:n]
    return out_flat.reshape(orig_shape)


def _ref(x):
    return x * jax.nn.sigmoid(1.702 * x)


if __name__ == "__main__":
    key = jax.random.PRNGKey(0)

    # Small shape consistent with the module's elementwise forward.
    x = jax.random.normal(key, (2, 8, 32), dtype=jnp.float32)
    y = jax.block_until_ready(swigelu(x))
    assert y.shape == x.shape and y.dtype == x.dtype
    assert jnp.allclose(y, _ref(x), atol=1e-6, rtol=1e-6)

    # Exercise the ragged / flat-tail-padding path as well.
    x2 = jax.random.normal(jax.random.PRNGKey(1), (3, 7, 5), dtype=jnp.float32)
    y2 = jax.block_until_ready(swigelu(x2))
    assert y2.shape == x2.shape and y2.dtype == x2.dtype
    assert jnp.allclose(y2, _ref(x2), atol=1e-6, rtol=1e-6)

    print("KERNEL_OK")
</pallas_src>

<mosaic_0001>
module attributes {stable_mosaic.version = 11 : i64} {
  func.func @_swigelu_kernel(%arg0: i32, %arg1: memref<1x512xf32, #tpu.memory_space<vmem>>, %arg2: memref<1x512xf32, #tpu.memory_space<vmem>>) attributes {dimension_semantics = [#tpu.dimension_semantics<parallel>], iteration_bounds = array<i64: 1>, scalar_prefetch = 0 : i64, scratch_operands = 0 : i64, tpu.core_type = #tpu.core_type<tc>, window_params = [{transform_indices = @transform_0, window_bounds = array<i64: 1, 512>}, {transform_indices = @transform_1, window_bounds = array<i64: 1, 512>}]} {
    %c0 = arith.constant 0 : index
    %c0_0 = arith.constant 0 : index
    %0 = vector.load %arg1[%c0, %c0_0] : memref<1x512xf32, #tpu.memory_space<vmem>>, vector<1x512xf32>
    %cst = arith.constant 1.702000e+00 : f32
    %1 = vector.broadcast %cst : f32 to vector<1x512xf32>
    %2 = arith.mulf %1, %0 : vector<1x512xf32>
    %3 = arith.negf %2 : vector<1x512xf32>
    %4 = math.exp %3 : vector<1x512xf32>
    %cst_1 = arith.constant 1.000000e+00 : f32
    %5 = vector.broadcast %cst_1 : f32 to vector<1x512xf32>
    %6 = arith.addf %5, %4 : vector<1x512xf32>
    %7 = arith.divf %5, %6 : vector<1x512xf32>
    %8 = arith.mulf %0, %7 : vector<1x512xf32>
    %c0_2 = arith.constant 0 : index
    %c0_3 = arith.constant 0 : index
    %9 = vector.load %arg2[%c0_2, %c0_3] : memref<1x512xf32, #tpu.memory_space<vmem>>, vector<1x512xf32>
    tpu.vector_store %arg2[%c0_2, %c0_3], %8 {strides = array<i32>} : memref<1x512xf32, #tpu.memory_space<vmem>>, vector<1x512xf32>,
    return
  }
  func.func @transform_0(%arg0: i32) -> (i32, i32) {
    %c0_i32 = arith.constant 0 : i32
    %c0_i32_0 = arith.constant 0 : i32
    return %arg0, %c0_i32 : i32, i32
  }
  func.func @transform_1(%arg0: i32) -> (i32, i32) {
    %c0_i32 = arith.constant 0 : i32
    %c0_i32_0 = arith.constant 0 : i32
    return %arg0, %c0_i32 : i32, i32
  }
}

</mosaic_0001>

<bundles_post_ra>
// kernel: tpu_custom_call.1
= control target key start
LH: loop header
LB: loop body
LE: loop exit
PB: predicated region body
PF: predicated region fallthrough
CT: control target
= control target key end

     0   :  { %6 = vsyncpa [#allocation3], 0  ;;  %s119_s0 = inlined_call_operand.hbm [shape: f32[1,512], index: 0, kind: input, shape index: {}]   ;;  %s120_s1 = inlined_call_operand.hbm [shape: f32[1,512], index: 1, kind: output, shape index: {}]  }
   0x1   :  { %7 = vsyncpa [#allocation4], 0  ;;  %s101_s6 = smov [#allocation2]  }
   0x2   :  { %s14_s7 = sshll.u32 %s101_s6, 4  ;;  %s15_s7 = int_to_ptr.vmem [resolvable:$true] %s14_s7 }
   0x3   :  { %s65_s8 = scalar_lea.vmem %s15_s7, 64  ;;  %p70_p1 = scmp.lt.s32.totalorder %s15_s7, %s15_s7 }
   0x4   :  { %p66_p0 = scmp.ne.s32.totalorder %s15_s7, %s65_s8  ;;  %p71_p2 = scmp.lt.s32.totalorder %s65_s8, %s65_s8 }
   0x6   :  { %p72_p3 = por %p71_p2, %p70_p1 }
   0x8   :  { %p73_p4 = pnand %p72_p3, %p66_p0 }
   0xa   :  { %76 = shalt.err (!%p73_p4)
}
   0xb   :  { %17 = dma.hbm_to_vmem [thread:$0]  %s119_s0, 64, %s15_s7, [#allocation3]  }
   0xc   :  { %97 = dma.done.wait [#allocation3], 64  }
   0xd   :  { %98 = vsyncadd [#allocation3], 4294967232  ;;  %v21_v0 = vld [vmem:[#allocation2] sm:$0xf]  ;;  %v30_v5 = vlaneseq  ;;  %s102_s11 = smov [#allocation5]  }
   0xe   :  { %v50_v1 = vmul.f32 -1.702, %v21_v0  ;;  %s41_s12 = sshll.u32 %s102_s11, 4  ;;  %s42_s12 = int_to_ptr.vmem [resolvable:$true] %s41_s12 }
   0xf   :  { %vm32_vm0 = vcmp.lt.s32.totalorder %v30_v5, 512  ;;  %s77_s13 = scalar_lea.vmem %s42_s12, 64  ;;  %p82_p6 = scmp.lt.s32.totalorder %s42_s12, %s42_s12 }
  0x10   :  { %v24_v2 = vmul.f32 1.442695, %v50_v1  ;;  %p78_p5 = scmp.ne.s32.totalorder %s42_s12, %s77_s13  ;;  %p83_p7 = scmp.lt.s32.totalorder %s77_s13, %s77_s13 }
  0x12   :  { %53 = vpow2.f32 %v24_v2  ;;  %p84_p8 = por %p83_p7, %p82_p6 }
  0x14   :  { %p85_p9 = pnand %p84_p8, %p78_p5 }
  0x1f   :  { %v54_v3 = vpop.eup %53 }
  0x20   :  { %v26_v4 = vadd.f32 1.0, %v54_v3 }
  0x22   :  { %55 = vrcp.f32 %v26_v4 }
  0x2f   :  { %v56_v6 = vpop.eup %55 }
  0x30   :  { %v29_v7 = vmul.f32 %v56_v6, %v21_v0 }
  0x32   :  { %34 = vst.msk [vmem:[#allocation5] sm:$0xf] %vm32_vm0, %v29_v7 }
  0x33   :  { %88 = shalt.err (!%p85_p9)
}
  0x34   :  { %44 = dma.vmem_to_hbm [thread:$0]  %s42_s12, 64, %s120_s1, [#allocation4]  }
  0x35   :  { %99 = dma.done.wait [#allocation4], 64  }
  0x36   :  { %100 = vsyncadd [#allocation4], 4294967232 }
  0x37   :  { %48 = vsyncpa [#allocation3], 1 }
  0x38   :  { %49 = vsyncpa [#allocation4], 1 }

</bundles_post_ra>
